<compile_context>
chip_gen: v5e
topology: v5e:2x2
jax: 0.10.0
libtpu: 0.0.40
codegen_flags: <defaults>
</compile_context>

<pallas_src>
import jax
import jax.numpy as jnp
from jax.experimental import pallas as pl
from jax.experimental.pallas import tpu as pltpu

_LANE = 128
# Per-buffer tile budget. 1 input + 1 output, each double-buffered ->
# total VMEM ~= 4 * _MAX_TILE_BYTES = 8 MiB (safe on every chip's default).
_MAX_TILE_BYTES = 2 * 1024 * 1024


def _copy_kernel(x_ref, o_ref):
    # Pure pass-through on the current tile.
    o_ref[...] = x_ref[...]


def _choose_cols(total: int) -> int:
    """Lane-dense column width: a multiple of 128 whenever possible."""
    if total < _LANE:
        return max(total, 1)  # tiny array: single full-extent block
    for cand in (4096, 2048, 1024, 512, 256, 128):
        if total >= cand:
            return cand
    return _LANE


def _choose_tile_rows(rows: int, cols: int, itemsize: int) -> int:
    """Row-tile: power of two >= 8, capped by the per-buffer VMEM budget."""
    if rows <= 8:
        return rows  # full-extent block (always legal)
    budget_rows = max(8, _MAX_TILE_BYTES // (cols * itemsize))
    tile = 8
    while tile * 2 <= min(rows, budget_rows, 1024):
        tile *= 2
    return tile


def _identity_copy_pallas(x: jnp.ndarray) -> jnp.ndarray:
    """Bit-exact copy of x through a Pallas TPU kernel (lane-dense tiling)."""
    orig_shape = x.shape
    total = int(x.size)
    if total == 0:
        return x

    itemsize = jnp.dtype(x.dtype).itemsize
    flat = x.reshape(-1)

    cols = _choose_cols(total)
    rows = pl.cdiv(total, cols)
    tile_rows = _choose_tile_rows(rows, cols, itemsize)
    rows_padded = pl.cdiv(rows, tile_rows) * tile_rows
    padded_total = rows_padded * cols

    if padded_total != total:
        flat = jnp.pad(flat, (0, padded_total - total))
    x2d = flat.reshape(rows_padded, cols)

    grid = (rows_padded // tile_rows,)

    out2d = pl.pallas_call(
        _copy_kernel,
        out_shape=jax.ShapeDtypeStruct((rows_padded, cols), x.dtype),
        grid_spec=pltpu.PrefetchScalarGridSpec(
            num_scalar_prefetch=0,
            grid=grid,
            in_specs=[pl.BlockSpec((tile_rows, cols), lambda i: (i, 0))],
            out_specs=pl.BlockSpec((tile_rows, cols), lambda i: (i, 0)),
        ),
        compiler_params=pltpu.CompilerParams(
            # Single grid axis is independent work -> shards across the two
            # TensorCores on v7x; harmless (no-op) on single-TC v5e/v6e.
            dimension_semantics=("parallel",),
            vmem_limit_bytes=32 * 1024 * 1024,
        ),
        input_output_aliases={0: 0},
    )(x2d)

    out = out2d.reshape(-1)
    if padded_total != total:
        out = out[:total]
    return out.reshape(orig_shape)


def identity_transform(x: jnp.ndarray, inv_t: bool = False, dim: int = -1,
                       *, materialize: bool = False) -> jnp.ndarray:
    """IdentityTransform.forward.

    Default (materialize=False): returns x unchanged — zero HBM traffic,
    exactly matching the PyTorch module's semantics and the review's top
    recommendation.  materialize=True forces a fresh buffer via the Pallas
    copy kernel (demonstration / explicit-copy path).
    """
    del inv_t, dim  # ignored, exactly like the PyTorch module
    if not materialize:
        return x
    return _identity_copy_pallas(x)


if __name__ == "__main__":
    key = jax.random.PRNGKey(0)

    # NCHW input, consistent with typical usage of the module.
    x = jax.random.normal(key, (2, 4, 16, 16), dtype=jnp.float32)

    # Recommended zero-cost path.
    y_fast = identity_transform(x)
    assert y_fast.shape == x.shape and y_fast.dtype == x.dtype

    # Pallas copy-kernel path (exercises the kernel).
    y = identity_transform(x, materialize=True)
    y = jax.block_until_ready(y)
    assert y.shape == x.shape and y.dtype == x.dtype
    assert bool(jnp.all(y == x))

    # Awkward shape + sub-32-bit dtype: exercises the pad-to-tile path.
    k2 = jax.random.PRNGKey(0)
    x2 = jax.random.normal(k2, (7, 33), dtype=jnp.bfloat16)
    y2 = jax.block_until_ready(identity_transform(x2, materialize=True))
    assert y2.shape == x2.shape and y2.dtype == x2.dtype
    assert bool(jnp.all(y2 == x2))

    print("KERNEL_OK")
</pallas_src>

<mosaic_0001>
module attributes {stable_mosaic.version = 11 : i64} {
  func.func @_copy_kernel(%arg0: i32, %arg1: memref<1x2048xf32, #tpu.memory_space<vmem>>, %arg2: memref<1x2048xf32, #tpu.memory_space<vmem>>) attributes {dimension_semantics = [#tpu.dimension_semantics<parallel>], iteration_bounds = array<i64: 1>, scalar_prefetch = 0 : i64, scratch_operands = 0 : i64, tpu.core_type = #tpu.core_type<tc>, window_params = [{transform_indices = @transform_0, window_bounds = array<i64: 1, 2048>}, {transform_indices = @transform_1, window_bounds = array<i64: 1, 2048>}]} {
    %c0 = arith.constant 0 : index
    %c0_0 = arith.constant 0 : index
    %0 = vector.load %arg1[%c0, %c0_0] : memref<1x2048xf32, #tpu.memory_space<vmem>>, vector<1x2048xf32>
    %c0_1 = arith.constant 0 : index
    %c0_2 = arith.constant 0 : index
    %1 = vector.load %arg2[%c0_1, %c0_2] : memref<1x2048xf32, #tpu.memory_space<vmem>>, vector<1x2048xf32>
    tpu.vector_store %arg2[%c0_1, %c0_2], %0 {strides = array<i32>} : memref<1x2048xf32, #tpu.memory_space<vmem>>, vector<1x2048xf32>,
    return
  }
  func.func @transform_0(%arg0: i32) -> (i32, i32) {
    %c0_i32 = arith.constant 0 : i32
    %c0_i32_0 = arith.constant 0 : i32
    return %arg0, %c0_i32 : i32, i32
  }
  func.func @transform_1(%arg0: i32) -> (i32, i32) {
    %c0_i32 = arith.constant 0 : i32
    %c0_i32_0 = arith.constant 0 : i32
    return %arg0, %c0_i32 : i32, i32
  }
}

</mosaic_0001>

<bundles_post_ra>
// kernel: tpu_custom_call.1
= control target key start
LH: loop header
LB: loop body
LE: loop exit
PB: predicated region body
PF: predicated region fallthrough
CT: control target
= control target key end

     0   :  { %6 = vsyncpa [#allocation3], 0  ;;  %s116_s0 = inlined_call_operand.hbm [shape: f32[1,2048], index: 0, kind: input, shape index: {}, may-alias: {0,1}]   ;;  %s117_s1 = inlined_call_operand.hbm [shape: f32[1,2048], index: 1, kind: output, shape index: {}, may-alias: {0,1}]  }
   0x1   :  { %7 = vsyncpa [#allocation4], 0  ;;  %s13_s8 = sshll.u32 %s116_s0, 4  ;;  %s98_s9 = smov [#allocation2]   ;;  %s14_s8 = int_to_ptr.hbm [resolvable:$true] %s13_s8 }
   0x2   :  { %s15_s10 = sshll.u32 %s98_s9, 4  ;;  %s16_s10 = int_to_ptr.vmem [resolvable:$true] %s15_s10 }
   0x3   :  { %18 = dma.hbm_to_vmem [thread:$0]  %s14_s8, 256, %s16_s10, [#allocation3]  }
   0x4   :  { %94 = dma.done.wait [#allocation3], 256  }
   0x5   :  { %95 = vsyncadd [#allocation3], 4294967040  ;;  %s99_s11 = smov [#allocation5]   ;;  %s34_s15 = sshll.u32 %s117_s1, 4  ;;  %v23_v0 = vld [vmem:[#allocation2] sm:$0xff]  ;;  %v24_v1 = vld [vmem:[#allocation2 + $0x8] sm:$0xff]  ;;  %s35_s15 = int_to_ptr.hbm [resolvable:$true] %s34_s15 }
   0x6   :  { %s32_s12 = sshll.u32 %s99_s11, 4  ;;  %25 = vst [vmem:[#allocation5] sm:$0xff] %v23_v0  ;;  %s33_s12 = int_to_ptr.vmem [resolvable:$true] %s32_s12 }
   0x7   :  { %26 = vst [vmem:[#allocation5 + $0x8] sm:$0xff] %v24_v1 }
   0x8   :  { %37 = dma.vmem_to_hbm [thread:$0]  %s33_s12, 256, %s35_s15, [#allocation4]  }
   0x9   :  { %96 = dma.done.wait [#allocation4], 256  }
   0xa   :  { %97 = vsyncadd [#allocation4], 4294967040 }
   0xb   :  { %42 = vsyncpa [#allocation3], 1 }
   0xc   :  { %43 = vsyncpa [#allocation4], 1 }

</bundles_post_ra>
